<compile_context>
chip_gen: v7x
topology: tpu7x:2x2x1
jax: 0.10.0
libtpu: 0.0.40
codegen_flags: <defaults>
</compile_context>

<pallas_src>
import math

import jax
import jax.numpy as jnp
from jax.experimental import pallas as pl
from jax.experimental.pallas import tpu as pltpu


def _euler_steps(t, step_size):
    """Replicates torchdiffeq's fixed-grid euler step sizes from 0 to t."""
    n = int(math.ceil(t / step_size - 1e-9))
    n = max(n, 1)
    dts = [step_size] * (n - 1)
    dts.append(t - (n - 1) * step_size)
    return tuple(float(d) for d in dts)


def _make_ode_euler_kernel(n_steps):
    """Kernel: apply the n_steps folded Euler matrices to one lane slab."""

    def kernel(m_ref, x_ref, o_ref):
        x = x_ref[...].astype(jnp.float32)          # (V, lane_blk), lane-dense
        # Static unroll: few steps, trip count is a compile-time constant.
        # Each step is a single MXU matmul: x <- M_k @ x.
        for k in range(n_steps):
            x = jnp.dot(m_ref[k], x, preferred_element_type=jnp.float32)
        o_ref[...] = x.astype(o_ref.dtype)

    return kernel


def ode_block_forward(x, adj, t, step_size, alpha=2.0):
    """ODEBlock.forward: Euler odeint of the graph-ODE, returns state at time t.

    x:   (B, C, V, L)  float32
    adj: (V, V)        float32 row-normalized adjacency
    """
    B, C, V, L = x.shape
    dts = _euler_steps(float(t), float(step_size))
    n_steps = len(dts)

    # Fold the per-step Euler scalars into the matrix:
    #   x + dt * 0.5*alpha*(A x - x) == ((1 - c*dt) I + c*dt A) x,  c = alpha/2
    c = 0.5 * float(alpha)
    eye = jnp.eye(V, dtype=jnp.float32)
    adj32 = adj.astype(jnp.float32)
    m = jnp.stack([(1.0 - c * dt) * eye + (c * dt) * adj32 for dt in dts])

    # Lane-dense layout: (B, C, V, L) -> (V, B*C*L).
    NL = B * C * L
    xr = jnp.transpose(x, (2, 0, 1, 3)).reshape(V, NL)

    # Two parallel lane blocks when divisible (keeps both v7x TCs busy);
    # otherwise one full-extent block.
    n_blk = 2 if (NL % 256 == 0) else 1
    lane_blk = NL // n_blk

    kernel = _make_ode_euler_kernel(n_steps)

    out = pl.pallas_call(
        kernel,
        out_shape=jax.ShapeDtypeStruct((V, NL), x.dtype),
        grid_spec=pltpu.PrefetchScalarGridSpec(
            num_scalar_prefetch=0,
            grid=(n_blk,),
            in_specs=[
                # Stacked per-step Euler matrices, shared across grid steps.
                pl.BlockSpec((n_steps, V, V), lambda j: (0, 0, 0)),
                # One lane-dense (V, lane_blk) slab of the folded batch axis.
                pl.BlockSpec((V, lane_blk), lambda j: (0, j)),
            ],
            out_specs=pl.BlockSpec((V, lane_blk), lambda j: (0, j)),
        ),
        compiler_params=pltpu.CompilerParams(
            dimension_semantics=("parallel",)),
    )(m, xr)

    return jnp.transpose(out.reshape(V, B, C, L), (1, 2, 0, 3))


def _reference(x, adj, t, step_size, alpha=2.0):
    """Pure-JAX reference of the same Euler integration (original formulation)."""
    dts = _euler_steps(float(t), float(step_size))
    y = x.astype(jnp.float32)
    for dt in dts:
        ax = jnp.einsum('vw,bcwl->bcvl', adj, y)
        y = y + dt * (0.5 * alpha * (ax - y))
    return y.astype(x.dtype)


if __name__ == "__main__":
    # Small shapes consistent with MTGODE's (batch, channels, nodes, seq) input.
    B, C, V, L = 2, 4, 16, 16
    t_end = 1.0
    step_size = 0.25
    alpha = 2.0

    key = jax.random.PRNGKey(0)
    kx, ka = jax.random.split(key)

    x = jax.random.normal(kx, (B, C, V, L), dtype=jnp.float32)

    # Deterministic row-normalized adjacency (self-loops + random weights).
    raw = jax.random.uniform(ka, (V, V), dtype=jnp.float32)
    raw = raw + jnp.eye(V, dtype=jnp.float32)
    adj = raw / jnp.sum(raw, axis=1, keepdims=True)

    out = ode_block_forward(x, adj, t_end, step_size, alpha)
    out = jax.block_until_ready(out)

    ref = _reference(x, adj, t_end, step_size, alpha)
    assert out.shape == (B, C, V, L)
    # Folding the Euler scalars into M_k is mathematically identical but has a
    # different rounding order than the step-by-step reference -> slightly
    # looser tolerance.
    assert jnp.allclose(out, ref, atol=1e-4, rtol=1e-4), "mismatch vs reference"

    print("KERNEL_OK")
</pallas_src>

<mosaic_0001>
module attributes {stable_mosaic.version = 11 : i64} {
  func.func @kernel(%arg0: i32, %arg1: memref<4x16x16xf32, #tpu.memory_space<vmem>>, %arg2: memref<16x128xf32, #tpu.memory_space<vmem>>, %arg3: memref<16x128xf32, #tpu.memory_space<vmem>>) attributes {dimension_semantics = [#tpu.dimension_semantics<parallel>], iteration_bounds = array<i64: 1>, scalar_prefetch = 0 : i64, scratch_operands = 0 : i64, tpu.core_type = #tpu.core_type<tc>, window_params = [{pipeline_mode = #tpu.pipeline_mode<synchronous>, transform_indices = @transform_0, window_bounds = array<i64: 4, 16, 16>}, {transform_indices = @transform_1, window_bounds = array<i64: 16, 128>}, {transform_indices = @transform_2, window_bounds = array<i64: 16, 128>}]} {
    %c0 = arith.constant 0 : index
    %c0_0 = arith.constant 0 : index
    %0 = vector.load %arg2[%c0, %c0_0] : memref<16x128xf32, #tpu.memory_space<vmem>>, vector<16x128xf32>
    %c0_1 = arith.constant 0 : index
    %c0_2 = arith.constant 0 : index
    %c0_3 = arith.constant 0 : index
    %1 = vector.load %arg1[%c0_1, %c0_2, %c0_3] : memref<4x16x16xf32, #tpu.memory_space<vmem>>, vector<1x16x16xf32>
    %2 = vector.shape_cast %1 : vector<1x16x16xf32> to vector<16x16xf32>
    %cst = arith.constant dense<0.000000e+00> : vector<16x128xf32>
    %3 = tpu.matmul %2, %0, %cst {dimension_numbers = #tpu.dot_dimension_numbers<[1], [0], [0], [1], [0, 0, 1, 1], [], []>} : vector<16x16xf32>, vector<16x128xf32>, vector<16x128xf32> -> vector<16x128xf32>
    %c1 = arith.constant 1 : index
    %c0_4 = arith.constant 0 : index
    %c0_5 = arith.constant 0 : index
    %4 = vector.load %arg1[%c1, %c0_4, %c0_5] : memref<4x16x16xf32, #tpu.memory_space<vmem>>, vector<1x16x16xf32>
    %5 = vector.shape_cast %4 : vector<1x16x16xf32> to vector<16x16xf32>
    %cst_6 = arith.constant dense<0.000000e+00> : vector<16x128xf32>
    %6 = tpu.matmul %5, %3, %cst_6 {dimension_numbers = #tpu.dot_dimension_numbers<[1], [0], [0], [1], [0, 0, 1, 1], [], []>} : vector<16x16xf32>, vector<16x128xf32>, vector<16x128xf32> -> vector<16x128xf32>
    %c2 = arith.constant 2 : index
    %c0_7 = arith.constant 0 : index
    %c0_8 = arith.constant 0 : index
    %7 = vector.load %arg1[%c2, %c0_7, %c0_8] : memref<4x16x16xf32, #tpu.memory_space<vmem>>, vector<1x16x16xf32>
    %8 = vector.shape_cast %7 : vector<1x16x16xf32> to vector<16x16xf32>
    %cst_9 = arith.constant dense<0.000000e+00> : vector<16x128xf32>
    %9 = tpu.matmul %8, %6, %cst_9 {dimension_numbers = #tpu.dot_dimension_numbers<[1], [0], [0], [1], [0, 0, 1, 1], [], []>} : vector<16x16xf32>, vector<16x128xf32>, vector<16x128xf32> -> vector<16x128xf32>
    %c3 = arith.constant 3 : index
    %c0_10 = arith.constant 0 : index
    %c0_11 = arith.constant 0 : index
    %10 = vector.load %arg1[%c3, %c0_10, %c0_11] : memref<4x16x16xf32, #tpu.memory_space<vmem>>, vector<1x16x16xf32>
    %11 = vector.shape_cast %10 : vector<1x16x16xf32> to vector<16x16xf32>
    %cst_12 = arith.constant dense<0.000000e+00> : vector<16x128xf32>
    %12 = tpu.matmul %11, %9, %cst_12 {dimension_numbers = #tpu.dot_dimension_numbers<[1], [0], [0], [1], [0, 0, 1, 1], [], []>} : vector<16x16xf32>, vector<16x128xf32>, vector<16x128xf32> -> vector<16x128xf32>
    %c0_13 = arith.constant 0 : index
    %c0_14 = arith.constant 0 : index
    %13 = vector.load %arg3[%c0_13, %c0_14] : memref<16x128xf32, #tpu.memory_space<vmem>>, vector<16x128xf32>
    tpu.vector_store %arg3[%c0_13, %c0_14], %12 {strides = array<i32>} : memref<16x128xf32, #tpu.memory_space<vmem>>, vector<16x128xf32>,
    return
  }
  func.func @transform_0(%arg0: i32) -> (i32, i32, i32) {
    %c0_i32 = arith.constant 0 : i32
    %c0_i32_0 = arith.constant 0 : i32
    %c0_i32_1 = arith.constant 0 : i32
    %c0_i32_2 = arith.constant 0 : i32
    return %c0_i32, %c0_i32_0, %c0_i32_1 : i32, i32, i32
  }
  func.func @transform_1(%arg0: i32) -> (i32, i32) {
    %c0_i32 = arith.constant 0 : i32
    %c0_i32_0 = arith.constant 0 : i32
    return %c0_i32, %arg0 : i32, i32
  }
  func.func @transform_2(%arg0: i32) -> (i32, i32) {
    %c0_i32 = arith.constant 0 : i32
    %c0_i32_0 = arith.constant 0 : i32
    return %c0_i32, %arg0 : i32, i32
  }
}

</mosaic_0001>

<bundles_post_ra>
// kernel: tpu_custom_call.1
= control target key start
LH: loop header
LB: loop body
LE: loop exit
PB: predicated region body
PF: predicated region fallthrough
CT: control target
= control target key end

     0   :  { %7 = vsyncpa [#allocation3], 0  ;;  %s616_s0 = inlined_call_operand.hbm [shape: f32[4,16,16], index: 0, kind: input, shape index: {}]   ;;  %s617_s1 = inlined_call_operand.hbm [shape: f32[16,128], index: 1, kind: input, shape index: {}]   ;;  %s618_s2 = inlined_call_operand.hbm [shape: f32[16,128], index: 2, kind: output, shape index: {}]  }
   0x1   :  { %8 = vsyncpa [#allocation6], 0 }
   0x2   :  { %9 = vsyncpa [#allocation4], 0  ;;  %s543_s9 = smov [#allocation2]   ;;  %s471_s13 = scalar_lea.hbm %s616_s0, 1024 }
   0x3   :  { %s15_s10 = sshll.u32 %s543_s9, 4  ;;  %p472_p0 = scmp.ne.s32.totalorder %s616_s0, %s471_s13  ;;  %s16_s10 = int_to_ptr.vmem [resolvable:$true] %s15_s10 }
   0x4   :  { %p475_p1 = scmp.lt.u32.totalorder %s471_s13, %s616_s0 }
   0x6   :  { %p477_p2 = pnand %p475_p1, %p472_p0 }
   0x8   :  { %480 = shalt.err (!%p477_p2)
}
   0x9   :  { %s481_s18 = scalar_lea.vmem %s16_s10, 1024  ;;  %p486_p4 = scmp.lt.s32.totalorder %s16_s10, %s16_s10 }
   0xa   :  { %p482_p3 = scmp.ne.s32.totalorder %s16_s10, %s481_s18  ;;  %p487_p5 = scmp.lt.s32.totalorder %s481_s18, %s481_s18 }
   0xc   :  { %p488_p6 = por %p487_p5, %p486_p4 }
   0xe   :  { %p489_p7 = pnand %p488_p6, %p482_p3 }
  0x10   :  { %492 = shalt.err (!%p489_p7)
}
  0x11   :  { %s544_s19 = smov 128   ;;  %s545_s20 = smov 8  }
  0x12   :  { %21 = dma.hbm_to_vmem [thread:$0]  %s616_s0, 1024, %s16_s10, [#allocation3], %s544_s19, %s544_s19, %s545_s20  }
  0x13   :  { %s546_s23 = smov [#allocation5]   ;;  %s493_s27 = scalar_lea.hbm %s617_s1, 256 }
  0x14   :  { %s27_s24 = sshll.u32 %s546_s23, 4  ;;  %p494_p8 = scmp.ne.s32.totalorder %s617_s1, %s493_s27  ;;  %s28_s24 = int_to_ptr.vmem [resolvable:$true] %s27_s24 }
  0x15   :  { %p497_p9 = scmp.lt.u32.totalorder %s493_s27, %s617_s1 }
  0x17   :  { %p499_p10 = pnand %p497_p9, %p494_p8 }
  0x19   :  { %502 = shalt.err (!%p499_p10)
}
  0x1a   :  { %s503_s4 = scalar_lea.vmem %s28_s24, 256  ;;  %p508_p12 = scmp.lt.s32.totalorder %s28_s24, %s28_s24 }
  0x1b   :  { %p504_p11 = scmp.ne.s32.totalorder %s28_s24, %s503_s4  ;;  %p509_p13 = scmp.lt.s32.totalorder %s503_s4, %s503_s4 }
  0x1d   :  { %p510_p0 = por %p509_p13, %p508_p12 }
  0x1f   :  { %p511_p1 = pnand %p510_p0, %p504_p11 }
  0x21   :  { %514 = shalt.err (!%p511_p1)
}
  0x22   :  { %33 = dma.hbm_to_vmem [thread:$0]  %s617_s1, 256, %s28_s24, [#allocation6], %s544_s19, %s544_s19, %s545_s20  }
  0x23   :  { %537 = dma.done.wait [#allocation3], 1024  }
  0x24   :  { %538 = vsyncadd [#allocation3], 4294966272 }
  0x25   :  { %539 = dma.done.wait [#allocation6], 256  }
  0x26   :  { %540 = vsyncadd [#allocation6], 4294967040  ;;  %vm44_vm0 = vcmask 130048   ;;  %v40_v0 = vld [vmem:[#allocation5] sm:$0xff]  ;;  %v41_v1 = vld [vmem:[#allocation5 + $0x8] sm:$0xff]  ;;  %s547_s1 = smov [#allocation7]  }
  0x27   :  { %v42_v2 = vld [vmem:[#allocation2] sm:$0xff]  ;;  %v450_v3 = vpack.c.bf16 %v41_v1, %v40_v0  ;;  %v43_v4 = vld [vmem:[#allocation2 + $0x8] sm:$0xff]  ;;  %v127_v5 = vld [vmem:[#allocation2 + $0x10] sm:$0xff]  ;;  %s385_s6 = sshll.u32 %s547_s1, 4  ;;  %s386_s6 = int_to_ptr.vmem [resolvable:$true] %s385_s6 }
  0x28   :  { %426 = vmatprep.mubr.msk.f32.mxu0 %vm44_vm0, %v42_v2  ;;  %433 = vmatprep.mubr.msk.f32.mxu1 %vm44_vm0, %v127_v5  ;;  %v128_v9 = vld [vmem:[#allocation2 + $0x18] sm:$0xff]  ;;  %v211_v10 = vld [vmem:[#allocation2 + $0x20] sm:$0xff]  ;;  %v212_v14 = vld [vmem:[#allocation2 + $0x28] sm:$0xff]  ;;  %s515_s7 = scalar_lea.vmem %s386_s6, 256  ;;  %p520_p3 = scmp.lt.s32.totalorder %s386_s6, %s386_s6 }
  0x29   :  { %451 = vmatprep.subr.bf16.mxu0 %v450_v3  ;;  %v295_v15 = vld [vmem:[#allocation2 + $0x30] sm:$0xff]  ;;  %v296_v19 = vld [vmem:[#allocation2 + $0x38] sm:$0xff]  ;;  %p516_p2 = scmp.ne.s32.totalorder %s386_s6, %s515_s7  ;;  %p521_p4 = scmp.lt.s32.totalorder %s515_s7, %s515_s7 }
  0x2a   :  { %453 = vmatpush3.bf16.msra.mxu0 %v450_v3 }
  0x2b   :  { %p522_p5 = por %p521_p4, %p520_p3 }
  0x2d   :  { %427 = vmatmul.mubr.msk.f32.vlgmr.msra.gmra.mrb[0].mxu0 %vm44_vm0, %v43_v4  ;;  %p523_p6 = pnand %p522_p5, %p516_p2 }
  0x2e   :  { %440 = vmatprep.mubr.msk.f32.mxu0 %vm44_vm0, %v211_v10 }
 0x100   :  { %v428_v6 = vpop.f32.mrb[0].mxu0 }
 0x101   :  { %v117_v7 = vpop.f32.mrb[1].mxu0 }
 0x102   :  { %v454_v8 = vpack.c.bf16 %v428_v6, %v117_v7 }
 0x104   :  { %455 = vmatprep.subr.bf16.mxu1 %v454_v8 }
 0x105   :  { %457 = vmatpush3.bf16.msra.mxu1 %v454_v8 }
 0x108   :  { %434 = vmatmul.mubr.msk.f32.vlgmr.msra.gmra.mrb[0].mxu1 %vm44_vm0, %v128_v9 }
 0x109   :  { %447 = vmatprep.mubr.msk.f32.mxu1 %vm44_vm0, %v295_v15 }
 0x1db   :  { %v435_v11 = vpop.f32.mrb[0].mxu1 }
 0x1dc   :  { %v201_v12 = vpop.f32.mrb[1].mxu1 }
 0x1dd   :  { %v458_v13 = vpack.c.bf16 %v435_v11, %v201_v12 }
 0x1df   :  { %459 = vmatprep.subr.bf16.mxu0 %v458_v13 }
 0x1e0   :  { %461 = vmatpush3.bf16.msra.mxu0 %v458_v13 }
 0x1e3   :  { %441 = vmatmul.mubr.msk.f32.vlgmr.msra.gmra.mrb[2].mxu0 %vm44_vm0, %v212_v14 }
 0x2b6   :  { %v442_v16 = vpop.f32.mrb[2].mxu0 }
 0x2b7   :  { %v285_v17 = vpop.f32.mrb[3].mxu0 }
 0x2b8   :  { %v462_v18 = vpack.c.bf16 %v442_v16, %v285_v17 }
 0x2ba   :  { %463 = vmatprep.subr.bf16.mxu1 %v462_v18 }
 0x2bb   :  { %465 = vmatpush3.bf16.msra.mxu1 %v462_v18 }
 0x2be   :  { %448 = vmatmul.mubr.msk.f32.vlgmr.msra.gmra.mrb[2].mxu1 %vm44_vm0, %v296_v19 }
 0x391   :  { %v449_v20 = vpop.f32.mrb[2].mxu1 }
 0x392   :  { %379 = vst [vmem:[#allocation7 + $0x8] sm:$0xff] %v449_v20  ;;  %v369_v21 = vpop.f32.mrb[3].mxu1 }
 0x393   :  { %378 = vst [vmem:[#allocation7] sm:$0xff] %v369_v21 }
 0x394   :  { %526 = shalt.err (!%p523_p6)
}
 0x395   :  { %s527_s10 = scalar_lea.hbm %s618_s2, 256 }
 0x396   :  { %p528_p7 = scmp.ne.s32.totalorder %s618_s2, %s527_s10  ;;  %p531_p8 = scmp.lt.u32.totalorder %s527_s10, %s618_s2 }
 0x398   :  { %p533_p9 = pnand %p531_p8, %p528_p7 }
 0x39a   :  { %536 = shalt.err (!%p533_p9)
}
 0x39b   :  { %391 = dma.vmem_to_hbm [thread:$0]  %s386_s6, 256, %s618_s2, [#allocation4], %s544_s19, %s544_s19, %s545_s20  }
 0x39c   :  { %541 = dma.done.wait [#allocation4], 256  }
 0x39d   :  { %542 = vsyncadd [#allocation4], 4294967040 }
 0x39e   :  { %395 = vsyncpa [#allocation3], 1 }
 0x39f   :  { %396 = vsyncpa [#allocation6], 1 }
 0x3a0   :  { %397 = vsyncpa [#allocation4], 1 }

</bundles_post_ra>
